<compile_context>
chip_gen: v7x
topology: tpu7x:2x2x1
jax: 0.10.0
libtpu: 0.0.40
codegen_flags: <defaults>
</compile_context>

<pallas_src>
import jax
import jax.numpy as jnp
from jax.experimental import pallas as pl
from jax.experimental.pallas import tpu as pltpu


# ---------------------------------------------------------------------------
# Kernels
# ---------------------------------------------------------------------------
def _matmul_bias_kernel(x_ref, w_ref, b_ref, o_ref, acc_ref):
    """K-tiled matmul, f32 accumulator; bias seeds the accumulator at k==0."""
    k = pl.program_id(2)

    @pl.when(k == 0)
    def _():
        acc_ref[...] = jnp.broadcast_to(
            b_ref[...].astype(jnp.float32), acc_ref.shape
        )

    acc_ref[...] += jnp.dot(
        x_ref[...], w_ref[...], preferred_element_type=jnp.float32
    )

    @pl.when(k == pl.num_programs(2) - 1)
    def _():
        o_ref[...] = acc_ref[...].astype(o_ref.dtype)


def _matmul_kernel(x_ref, w_ref, o_ref, acc_ref):
    """K-tiled matmul without bias."""
    k = pl.program_id(2)

    @pl.when(k == 0)
    def _():
        acc_ref[...] = jnp.zeros_like(acc_ref)

    acc_ref[...] += jnp.dot(
        x_ref[...], w_ref[...], preferred_element_type=jnp.float32
    )

    @pl.when(k == pl.num_programs(2) - 1)
    def _():
        o_ref[...] = acc_ref[...].astype(o_ref.dtype)


def _resident_bias_kernel(x_ref, w_ref, b_ref, o_ref):
    """Weight-resident path: full K/N per block; weights fetched from HBM once."""
    acc = jnp.dot(x_ref[...], w_ref[...], preferred_element_type=jnp.float32)
    o_ref[...] = (acc + b_ref[...].astype(jnp.float32)).astype(o_ref.dtype)


def _resident_kernel(x_ref, w_ref, o_ref):
    o_ref[...] = jnp.dot(
        x_ref[...], w_ref[...], preferred_element_type=jnp.float32
    ).astype(o_ref.dtype)


# ---------------------------------------------------------------------------
# Tiling helpers
# ---------------------------------------------------------------------------
_LANE = 128
_PALLAS_MIN_MACS = 128 * 128 * 128       # below this, XLA's fused matmul wins
_RESIDENT_W_BYTES = 3 * 1024 * 1024      # padded weights <= 3 MiB -> resident path
_RESIDENT_XO_BYTES = 8 * 1024 * 1024     # budget for x/out double buffers (fast path)


def _cdiv(a, b):
    return -(-a // b)


def _round_up(x, m):
    return _cdiv(x, m) * m


def _sublane_multiple(dtype):
    # f32 -> 8, bf16/f16 -> 16, int8/fp8 -> 32 (sublane packing).
    return {4: 8, 2: 16, 1: 32}.get(jnp.dtype(dtype).itemsize, 8)


def _tpu_generation():
    """Best-effort TPU generation (used only to pick tile targets)."""
    try:
        kind = jax.devices()[0].device_kind.lower()
    except Exception:
        return 6
    for gen in (7, 6, 5, 4, 3, 2):
        if f"v{gen}" in kind or f"tpu{gen}" in kind or f"tpu {gen}" in kind:
            return gen
    return 6


def _balanced_tile(dim, target, align):
    """Largest aligned tile <= target that splits `dim` into near-equal blocks."""
    if dim <= target:
        return _round_up(dim, align)
    nblocks = _cdiv(dim, target)
    return _round_up(_cdiv(dim, nblocks), align)


def _tile_targets(gen):
    # Generation-aware M/N targets (see header).  K tile fixed at 512: deeper K
    # does not reduce HBM traffic, so VMEM is spent on M/N reuse instead.
    if gen >= 7:
        tm_t, tn_t = 768, 768
    elif gen == 6:
        tm_t, tn_t = 1024, 1024
    else:
        tm_t, tn_t = 512, 512
    return tm_t, tn_t, 512


# ---------------------------------------------------------------------------
# Wrapper
# ---------------------------------------------------------------------------
@jax.jit
def _matmul_pallas_impl(x, weights, bias):
    *lead, K = x.shape
    Kw, N = weights.shape
    assert K == Kw, f"inner dims mismatch: {K} vs {Kw}"
    M = 1
    for d in lead:
        M *= d

    # torch.matmul-style type promotion for mixed-dtype callers.
    compute_dtype = jnp.promote_types(x.dtype, weights.dtype)
    out_dtype = compute_dtype
    if bias is not None:
        out_dtype = jnp.promote_types(out_dtype, bias.dtype)

    x2 = x.reshape(M, K).astype(compute_dtype)
    w2 = weights.astype(compute_dtype)

    # Tiny-problem short circuit: a Pallas grid of trivially small blocks is
    # pure per-step overhead on TPU.
    if M * N * K < _PALLAS_MIN_MACS:
        out2 = jnp.matmul(x2, w2, precision=jax.lax.Precision.HIGHEST)
        if bias is not None:
            out2 = out2 + bias
        return out2.astype(out_dtype).reshape(*lead, N)

    gen = _tpu_generation()
    itemsize = jnp.dtype(compute_dtype).itemsize
    o_itemsize = jnp.dtype(out_dtype).itemsize
    sub = _sublane_multiple(compute_dtype)
    tm_t, tn_t, tk_t = _tile_targets(gen)

    Kp_full = _round_up(K, _LANE)
    Np_full = _round_up(N, _LANE)

    # ------------------- Weight-resident fast path -------------------
    if Kp_full * Np_full * itemsize <= _RESIDENT_W_BYTES:
        row_bytes = 2 * (Kp_full * itemsize + Np_full * o_itemsize)
        tm_cap = (_RESIDENT_XO_BYTES // row_bytes) // sub * sub
        if tm_cap >= sub:
            tm = min(_balanced_tile(M, tm_t, sub), tm_cap)
            # v7x has 2 TensorCores sharing the parallel grid axes.
            if gen >= 7 and _cdiv(M, tm) < 2 and M > sub:
                tm = _round_up(_cdiv(M, 2), sub)
            Mp, Kp, Np = _round_up(M, tm), Kp_full, Np_full

            xp = x2
            if (Mp, Kp) != (M, K):
                xp = jnp.pad(x2, ((0, Mp - M), (0, Kp - K)))
            wp = w2
            if (Kp, Np) != (K, N):
                wp = jnp.pad(w2, ((0, Kp - K), (0, Np - N)))

            grid = (Mp // tm,)
            x_spec = pl.BlockSpec((tm, Kp), lambda i: (i, 0))
            w_spec = pl.BlockSpec((Kp, Np), lambda i: (0, 0))   # constant -> DMA'd once
            o_spec = pl.BlockSpec((tm, Np), lambda i: (i, 0))

            cost = pl.CostEstimate(
                flops=2 * M * N * K,
                transcendentals=0,
                bytes_accessed=(M * K * itemsize + K * N * itemsize
                                + M * N * o_itemsize
                                + (N * o_itemsize if bias is not None else 0)),
            )
            cp = pltpu.CompilerParams(dimension_semantics=("parallel",))

            if bias is not None:
                b2 = bias.reshape(1, N)
                if Np != N:
                    b2 = jnp.pad(b2, ((0, 0), (0, Np - N)))
                b_spec = pl.BlockSpec((1, Np), lambda i: (0, 0))
                out = pl.pallas_call(
                    _resident_bias_kernel,
                    out_shape=jax.ShapeDtypeStruct((Mp, Np), out_dtype),
                    grid_spec=pltpu.PrefetchScalarGridSpec(
                        num_scalar_prefetch=0,
                        grid=grid,
                        in_specs=[x_spec, w_spec, b_spec],
                        out_specs=o_spec,
                    ),
                    compiler_params=cp,
                    cost_estimate=cost,
                )(xp, wp, b2)
            else:
                out = pl.pallas_call(
                    _resident_kernel,
                    out_shape=jax.ShapeDtypeStruct((Mp, Np), out_dtype),
                    grid_spec=pltpu.PrefetchScalarGridSpec(
                        num_scalar_prefetch=0,
                        grid=grid,
                        in_specs=[x_spec, w_spec],
                        out_specs=o_spec,
                    ),
                    compiler_params=cp,
                    cost_estimate=cost,
                )(xp, wp)
            return out[:M, :N].reshape(*lead, N)

    # ------------------- General K-tiled path -------------------
    tm = _balanced_tile(M, tm_t, sub)
    tn = _balanced_tile(N, tn_t, _LANE)
    tk = _balanced_tile(K, tk_t, _LANE)

    if gen >= 7 and _cdiv(M, tm) * _cdiv(N, tn) < 2:
        # Give both v7x TensorCores parallel grid work.
        if M > sub:
            tm = _round_up(_cdiv(M, 2), sub)
        elif N > _LANE:
            tn = _round_up(_cdiv(N, 2), _LANE)

    Mp, Np, Kp = _round_up(M, tm), _round_up(N, tn), _round_up(K, tk)

    if (Mp, Kp) != (M, K):
        x2 = jnp.pad(x2, ((0, Mp - M), (0, Kp - K)))
    if (Kp, Np) != (K, N):
        w2 = jnp.pad(w2, ((0, Kp - K), (0, Np - N)))

    grid = (Mp // tm, Np // tn, Kp // tk)
    grid_m, grid_n, _ = grid

    x_spec = pl.BlockSpec((tm, tk), lambda i, j, k: (i, k))
    w_spec = pl.BlockSpec((tk, tn), lambda i, j, k: (k, j))
    o_spec = pl.BlockSpec((tm, tn), lambda i, j, k: (i, j))

    # Real streamed traffic: x is re-read once per N tile, w once per M tile.
    cost = pl.CostEstimate(
        flops=2 * M * N * K,
        transcendentals=0,
        bytes_accessed=(M * K * itemsize * grid_n
                        + K * N * itemsize * grid_m
                        + M * N * o_itemsize
                        + (N * o_itemsize * grid_m if bias is not None else 0)),
    )
    cp = pltpu.CompilerParams(
        dimension_semantics=("parallel", "parallel", "arbitrary"))
    scratch = [pltpu.VMEM((tm, tn), jnp.float32)]

    if bias is not None:
        b2 = bias.reshape(1, N)
        if Np != N:
            b2 = jnp.pad(b2, ((0, 0), (0, Np - N)))
        b_spec = pl.BlockSpec((1, tn), lambda i, j, k: (0, j))
        out = pl.pallas_call(
            _matmul_bias_kernel,
            out_shape=jax.ShapeDtypeStruct((Mp, Np), out_dtype),
            grid_spec=pltpu.PrefetchScalarGridSpec(
                num_scalar_prefetch=0,
                grid=grid,
                in_specs=[x_spec, w_spec, b_spec],
                out_specs=o_spec,
                scratch_shapes=scratch,
            ),
            compiler_params=cp,
            cost_estimate=cost,
        )(x2, w2, b2)
    else:
        out = pl.pallas_call(
            _matmul_kernel,
            out_shape=jax.ShapeDtypeStruct((Mp, Np), out_dtype),
            grid_spec=pltpu.PrefetchScalarGridSpec(
                num_scalar_prefetch=0,
                grid=grid,
                in_specs=[x_spec, w_spec],
                out_specs=o_spec,
                scratch_shapes=scratch,
            ),
            compiler_params=cp,
            cost_estimate=cost,
        )(x2, w2)

    return out[:M, :N].reshape(*lead, N)


def matmul_pallas(x, weights, bias=None):
    """Equivalent of Matmul.forward: x @ weights (+ bias)."""
    return _matmul_pallas_impl(x, weights, bias)


class Matmul:
    """JAX/Pallas equivalent of the PyTorch Matmul module."""

    def __init__(self, weights, bias=None):
        self.weights = weights
        self.bias = bias

    def __call__(self, x):
        return matmul_pallas(x, self.weights, self.bias)


# ---------------------------------------------------------------------------
# Demo / self-test
# ---------------------------------------------------------------------------
if __name__ == "__main__":
    key = jax.random.PRNGKey(0)
    kx, kw, kb, kx2, kw2, kb2, kx3, kw3, kb3 = jax.random.split(key, 9)

    def ref_matmul(x, w, b=None):
        out = jnp.matmul(x, w, precision=jax.lax.Precision.HIGHEST)
        return out if b is None else out + b

    # --- Main case (Pallas weight-resident fast path) ---
    B, S, K, N = 2, 128, 128, 256
    x = jax.random.normal(kx, (B, S, K), dtype=jnp.float32)
    weights = jax.random.normal(kw, (K, N), dtype=jnp.float32) * 0.1
    bias = jax.random.normal(kb, (N,), dtype=jnp.float32) * 0.1

    out = jax.block_until_ready(Matmul(weights, bias)(x))
    assert out.shape == (B, S, N)
    assert jnp.allclose(out, ref_matmul(x, weights, bias), atol=1e-4, rtol=1e-4)

    # bias=None path (also Pallas).
    out_nb = jax.block_until_ready(Matmul(weights)(x))
    assert jnp.allclose(out_nb, ref_matmul(x, weights), atol=1e-4, rtol=1e-4)

    # --- Ragged shapes (exercises the padding path) ---
    Br, Sr, Kr, Nr = 2, 130, 100, 200
    xr = jax.random.normal(kx2, (Br, Sr, Kr), dtype=jnp.float32)
    wr = jax.random.normal(kw2, (Kr, Nr), dtype=jnp.float32) * 0.1
    br = jax.random.normal(kb2, (Nr,), dtype=jnp.float32) * 0.1
    out_r = jax.block_until_ready(Matmul(wr, br)(xr))
    assert out_r.shape == (Br, Sr, Nr)
    assert jnp.allclose(out_r, ref_matmul(xr, wr, br), atol=1e-4, rtol=1e-4)

    # --- Larger weights (exercises the general K-tiled accumulator path) ---
    Bg, Sg, Kg, Ng = 2, 192, 1024, 1024
    xg = jax.random.normal(kx3, (Bg, Sg, Kg), dtype=jnp.float32)
    wg = jax.random.normal(kw3, (Kg, Ng), dtype=jnp.float32) * 0.1
    bg = jax.random.normal(kb3, (Ng,), dtype=jnp.float32) * 0.1
    out_g = jax.block_until_ready(Matmul(wg, bg)(xg))
    assert out_g.shape == (Bg, Sg, Ng)
    assert jnp.allclose(out_g, ref_matmul(xg, wg, bg), atol=1e-3, rtol=1e-3)

    # --- Tiny shapes (jnp.matmul short-circuit) ---
    xt = jax.random.normal(kx, (2, 8, 32), dtype=jnp.float32)
    wt = jax.random.normal(kw, (32, 32), dtype=jnp.float32) * 0.1
    bt = jax.random.normal(kb, (32,), dtype=jnp.float32) * 0.1
    out_t = jax.block_until_ready(Matmul(wt, bt)(xt))
    assert jnp.allclose(out_t, ref_matmul(xt, wt, bt), atol=1e-4, rtol=1e-4)

    print("KERNEL_OK")
</pallas_src>

<mosaic_0001>
module attributes {stable_mosaic.version = 11 : i64} {
  func.func @_resident_bias_kernel(%arg0: i32, %arg1: memref<256x128xf32, #tpu.memory_space<vmem>>, %arg2: memref<128x256xf32, #tpu.memory_space<vmem>>, %arg3: memref<1x256xf32, #tpu.memory_space<vmem>>, %arg4: memref<256x256xf32, #tpu.memory_space<vmem>>) attributes {dimension_semantics = [#tpu.dimension_semantics<parallel>], iteration_bounds = array<i64: 1>, scalar_prefetch = 0 : i64, scratch_operands = 0 : i64, tpu.core_type = #tpu.core_type<tc>, window_params = [{transform_indices = @transform_0, window_bounds = array<i64: 256, 128>}, {pipeline_mode = #tpu.pipeline_mode<synchronous>, transform_indices = @transform_1, window_bounds = array<i64: 128, 256>}, {pipeline_mode = #tpu.pipeline_mode<synchronous>, transform_indices = @transform_2, window_bounds = array<i64: 1, 256>}, {transform_indices = @transform_3, window_bounds = array<i64: 256, 256>}]} {
    %c0 = arith.constant 0 : index
    %c0_0 = arith.constant 0 : index
    %0 = vector.load %arg1[%c0, %c0_0] : memref<256x128xf32, #tpu.memory_space<vmem>>, vector<256x128xf32>
    %c0_1 = arith.constant 0 : index
    %c0_2 = arith.constant 0 : index
    %1 = vector.load %arg2[%c0_1, %c0_2] : memref<128x256xf32, #tpu.memory_space<vmem>>, vector<128x256xf32>
    %cst = arith.constant dense<0.000000e+00> : vector<256x256xf32>
    %2 = tpu.matmul %0, %1, %cst {dimension_numbers = #tpu.dot_dimension_numbers<[1], [0], [0], [1], [0, 0, 1, 1], [], []>} : vector<256x128xf32>, vector<128x256xf32>, vector<256x256xf32> -> vector<256x256xf32>
    %c0_3 = arith.constant 0 : index
    %c0_4 = arith.constant 0 : index
    %3 = vector.load %arg3[%c0_3, %c0_4] : memref<1x256xf32, #tpu.memory_space<vmem>>, vector<1x256xf32>
    %4 = vector.broadcast %3 : vector<1x256xf32> to vector<256x256xf32>
    %5 = arith.addf %2, %4 : vector<256x256xf32>
    %c0_5 = arith.constant 0 : index
    %c0_6 = arith.constant 0 : index
    %6 = vector.load %arg4[%c0_5, %c0_6] : memref<256x256xf32, #tpu.memory_space<vmem>>, vector<256x256xf32>
    tpu.vector_store %arg4[%c0_5, %c0_6], %5 {strides = array<i32>} : memref<256x256xf32, #tpu.memory_space<vmem>>, vector<256x256xf32>,
    return
  }
  func.func @transform_0(%arg0: i32) -> (i32, i32) {
    %c0_i32 = arith.constant 0 : i32
    %c0_i32_0 = arith.constant 0 : i32
    return %arg0, %c0_i32 : i32, i32
  }
  func.func @transform_1(%arg0: i32) -> (i32, i32) {
    %c0_i32 = arith.constant 0 : i32
    %c0_i32_0 = arith.constant 0 : i32
    %c0_i32_1 = arith.constant 0 : i32
    return %c0_i32, %c0_i32_0 : i32, i32
  }
  func.func @transform_2(%arg0: i32) -> (i32, i32) {
    %c0_i32 = arith.constant 0 : i32
    %c0_i32_0 = arith.constant 0 : i32
    %c0_i32_1 = arith.constant 0 : i32
    return %c0_i32, %c0_i32_0 : i32, i32
  }
  func.func @transform_3(%arg0: i32) -> (i32, i32) {
    %c0_i32 = arith.constant 0 : i32
    %c0_i32_0 = arith.constant 0 : i32
    return %arg0, %c0_i32 : i32, i32
  }
}

</mosaic_0001>

<bundles_post_ra>
// kernel: _matmul_pallas_impl.1
= control target key start
LH: loop header
LB: loop body
LE: loop exit
PB: predicated region body
PF: predicated region fallthrough
CT: control target
= control target key end

     0   :  { %8 = vsyncpa [#allocation3], 0  ;;  %s759_s0 = inlined_call_operand.hbm [shape: f32[256,128], index: 0, kind: input, shape index: {}]   ;;  %s760_s1 = inlined_call_operand.hbm [shape: f32[128,256], index: 1, kind: input, shape index: {}]   ;;  %s761_s2 = inlined_call_operand.vmem [shape: f32[1,256], index: 2, kind: input, shape index: {}]   ;;  %s762_s3 = inlined_call_operand.hbm [shape: f32[256,256], index: 3, kind: output, shape index: {}]  }
   0x1   :  { %9 = vsyncpa [#allocation6], 0 }
   0x2   :  { %10 = vsyncpa [#allocation4], 0  ;;  %s586_s12 = smov [#allocation2]   ;;  %s514_s16 = scalar_lea.hbm %s759_s0, 4096 }
   0x3   :  { %s16_s13 = sshll.u32 %s586_s12, 4  ;;  %p515_p0 = scmp.ne.s32.totalorder %s759_s0, %s514_s16  ;;  %s17_s13 = int_to_ptr.vmem [resolvable:$true] %s16_s13 }
   0x4   :  { %p518_p1 = scmp.lt.u32.totalorder %s514_s16, %s759_s0 }
   0x6   :  { %p520_p2 = pnand %p518_p1, %p515_p0 }
   0x8   :  { %523 = shalt.err (!%p520_p2)
}
   0x9   :  { %s524_s21 = scalar_lea.vmem %s17_s13, 4096  ;;  %p529_p4 = scmp.lt.s32.totalorder %s17_s13, %s17_s13 }
   0xa   :  { %p525_p3 = scmp.ne.s32.totalorder %s17_s13, %s524_s21  ;;  %p530_p5 = scmp.lt.s32.totalorder %s524_s21, %s524_s21 }
   0xc   :  { %p531_p6 = por %p530_p5, %p529_p4 }
   0xe   :  { %p532_p7 = pnand %p531_p6, %p525_p3 }
  0x10   :  { %535 = shalt.err (!%p532_p7)
}
  0x11   :  { %s587_s22 = smov 128   ;;  %s588_s23 = smov 8  }
  0x12   :  { %22 = dma.hbm_to_vmem [thread:$0]  %s759_s0, 4096, %s17_s13, [#allocation3], %s587_s22, %s587_s22, %s588_s23  }
  0x13   :  { %s589_s26 = smov [#allocation5]   ;;  %s536_s30 = scalar_lea.hbm %s760_s1, 4096 }
  0x14   :  { %s28_s27 = sshll.u32 %s589_s26, 4  ;;  %p537_p8 = scmp.ne.s32.totalorder %s760_s1, %s536_s30  ;;  %s29_s27 = int_to_ptr.vmem [resolvable:$true] %s28_s27 }
  0x15   :  { %p540_p9 = scmp.lt.u32.totalorder %s536_s30, %s760_s1 }
  0x17   :  { %p542_p10 = pnand %p540_p9, %p537_p8 }
  0x19   :  { %545 = shalt.err (!%p542_p10)
}
  0x1a   :  { %s546_s8 = scalar_lea.vmem %s29_s27, 4096  ;;  %p551_p12 = scmp.lt.s32.totalorder %s29_s27, %s29_s27 }
  0x1b   :  { %p547_p11 = scmp.ne.s32.totalorder %s29_s27, %s546_s8  ;;  %p552_p13 = scmp.lt.s32.totalorder %s546_s8, %s546_s8 }
  0x1d   :  { %p553_p0 = por %p552_p13, %p551_p12 }
  0x1f   :  { %p554_p1 = pnand %p553_p0, %p547_p11 }
  0x21   :  { %557 = shalt.err (!%p554_p1)
}
  0x22   :  { %s590_s0 = smov 256   ;;  %s591_s9 = smov 16  }
  0x23   :  { %34 = dma.hbm_to_vmem [thread:$0]  %s760_s1, 4096, %s29_s27, [#allocation6], %s590_s0, %s590_s0, %s591_s9  }
  0x24   :  { %580 = dma.done.wait [#allocation3], 4096  }
  0x25   :  { %581 = vsyncadd [#allocation3], 4294963200 }
  0x26   :  { %582 = dma.done.wait [#allocation6], 4096  }
  0x27   :  { %583 = vsyncadd [#allocation6], 4294963200  ;;  %v592_v0 = vmov 0.0   ;;  %v76_v1 = vld [vmem:[#allocation5 + $0x8] sm:$0xff]  ;;  %v78_v2 = vld [vmem:[#allocation5 + $0x18] sm:$0xff] }
  0x28   :  { %183 = vmatprep.mubr.f32.mxu0 %v592_v0  ;;  %279 = vmatprep.mubr.f32.mxu1 %v592_v0  ;;  %v75_v3 = vld [vmem:[#allocation5] sm:$0xff]  ;;  %v458_v4 = vpack.c.bf16 %v78_v2, %v76_v1  ;;  %v77_v5 = vld [vmem:[#allocation5 + $0x10] sm:$0xff]  ;;  %v80_v6 = vld [vmem:[#allocation5 + $0x28] sm:$0xff] }
  0x29   :  { %v82_v7 = vld [vmem:[#allocation5 + $0x38] sm:$0xff]  ;;  %v460_v8 = vpack.c.bf16 %v77_v5, %v75_v3  ;;  %v79_v10 = vld [vmem:[#allocation5 + $0x20] sm:$0xff]  ;;  %v81_v11 = vld [vmem:[#allocation5 + $0x30] sm:$0xff] }
  0x2a   :  { %v462_v9 = vpack.c.bf16 %v82_v7, %v80_v6  ;;  %v84_v12 = vld [vmem:[#allocation5 + $0x48] sm:$0xff]  ;;  %459 = vmatprep.subr.bf16.mxu0 %v458_v4  ;;  %490 = vmatprep.subr.bf16.mxu1 %v458_v4  ;;  %v86_v13 = vld [vmem:[#allocation5 + $0x58] sm:$0xff]  ;;  %v464_v14 = vpack.c.bf16 %v81_v11, %v79_v10  ;;  %v83_v16 = vld [vmem:[#allocation5 + $0x40] sm:$0xff] }
  0x2b   :  { %461 = vmatpush1.bf16.msra.mxu0 %v460_v8  ;;  %498 = vmatpush1.bf16.msra.mxu1 %v460_v8  ;;  %v466_v15 = vpack.c.bf16 %v86_v13, %v84_v12  ;;  %v85_v17 = vld [vmem:[#allocation5 + $0x50] sm:$0xff]  ;;  %v88_v18 = vld [vmem:[#allocation5 + $0x68] sm:$0xff]  ;;  %v90_v19 = vld [vmem:[#allocation5 + $0x78] sm:$0xff] }
  0x2c   :  { %463 = vmatprep.subr.bf16.mxu0 %v462_v9  ;;  %491 = vmatprep.subr.bf16.mxu1 %v462_v9  ;;  %v468_v20 = vpack.c.bf16 %v85_v17, %v83_v16  ;;  %v470_v21 = vpack.c.bf16 %v90_v19, %v88_v18  ;;  %v87_v22 = vld [vmem:[#allocation5 + $0x60] sm:$0xff]  ;;  %v89_v23 = vld [vmem:[#allocation5 + $0x70] sm:$0xff]  ;;  %v92_v24 = vld [vmem:[#allocation5 + $0x88] sm:$0xff]  ;;  %v109_v18 = vlaneseq }
  0x2d   :  { %v94_v25 = vld [vmem:[#allocation5 + $0x98] sm:$0xff]  ;;  %v472_v26 = vpack.c.bf16 %v89_v23, %v87_v22  ;;  %v91_v28 = vld [vmem:[#allocation5 + $0x80] sm:$0xff]  ;;  %v93_v29 = vld [vmem:[#allocation5 + $0x90] sm:$0xff] }
  0x2e   :  { %v474_v27 = vpack.c.bf16 %v94_v25, %v92_v24  ;;  %v96_v30 = vld [vmem:[#allocation5 + $0xa8] sm:$0xff]  ;;  %v98_v31 = vld [vmem:[#allocation5 + $0xb8] sm:$0xff]  ;;  %v476_v32 = vpack.c.bf16 %v93_v29, %v91_v28  ;;  %v95_v34 = vld [vmem:[#allocation5 + $0xa0] sm:$0xff]  ;;  %v110_v19 = vshrl.u32 %v109_v18, 7 }
  0x2f   :  { %465 = vmatpush1.bf16.msra.mxu0 %v464_v14  ;;  %499 = vmatpush1.bf16.msra.mxu1 %v464_v14  ;;  %v478_v33 = vpack.c.bf16 %v98_v31, %v96_v30  ;;  %v97_v35 = vld [vmem:[#allocation5 + $0xb0] sm:$0xff]  ;;  %v100_v36 = vld [vmem:[#allocation5 + $0xc8] sm:$0xff]  ;;  %v102_v37 = vld [vmem:[#allocation5 + $0xd8] sm:$0xff] }
  0x30   :  { %467 = vmatprep.subr.bf16.mxu0 %v466_v15  ;;  %492 = vmatprep.subr.bf16.mxu1 %v466_v15  ;;  %v480_v38 = vpack.c.bf16 %v97_v35, %v95_v34  ;;  %v482_v39 = vpack.c.bf16 %v102_v37, %v100_v36  ;;  %v99_v40 = vld [vmem:[#allocation5 + $0xc0] sm:$0xff]  ;;  %v101_v41 = vld [vmem:[#allocation5 + $0xd0] sm:$0xff]  ;;  %v104_v42 = vld [vmem:[#allocation5 + $0xe8] sm:$0xff]  ;;  %v115_v22 = vsub.s32 1, %v110_v19 }
  0x31   :  { %v106_v43 = vld [vmem:[#allocation5 + $0xf8] sm:$0xff]  ;;  %v484_v44 = vpack.c.bf16 %v101_v41, %v99_v40  ;;  %v103_v46 = vld [vmem:[#allocation5 + $0xe0] sm:$0xff]  ;;  %v105_v47 = vld [vmem:[#allocation5 + $0xf0] sm:$0xff] }
  0x32   :  { %v486_v45 = vpack.c.bf16 %v106_v43, %v104_v42  ;;  %v488_v48 = vpack.c.bf16 %v105_v47, %v103_v46  ;;  %v43_v49 = vld [vmem:[#allocation2] sm:$0xff]  ;;  %v44_v51 = vld [vmem:[#allocation2 + $0x8] sm:$0xff]  ;;  %v45_v53 = vld [vmem:[#allocation2 + $0x10] sm:$0xff] }
  0x33   :  { %469 = vmatpush1.bf16.msra.mxu0 %v468_v20  ;;  %500 = vmatpush1.bf16.msra.mxu1 %v468_v20  ;;  %v59_v50 = vld [vmem:[#allocation2 + $0x80] sm:$0xff]  ;;  %v60_v52 = vld [vmem:[#allocation2 + $0x88] sm:$0xff]  ;;  %v61_v54 = vld [vmem:[#allocation2 + $0x90] sm:$0xff]  ;;  %v111_v20 = vsub.s32 0, %v110_v19 }
  0x34   :  { %471 = vmatprep.subr.bf16.mxu0 %v470_v21  ;;  %493 = vmatprep.subr.bf16.mxu1 %v470_v21  ;;  %v46_v55 = vld [vmem:[#allocation2 + $0x18] sm:$0xff]  ;;  %v47_v57 = vld [vmem:[#allocation2 + $0x20] sm:$0xff]  ;;  %v48_v59 = vld [vmem:[#allocation2 + $0x28] sm:$0xff] }
  0x35   :  { %v62_v56 = vld [vmem:[#allocation2 + $0x98] sm:$0xff]  ;;  %v63_v58 = vld [vmem:[#allocation2 + $0xa0] sm:$0xff]  ;;  %v64_v60 = vld [vmem:[#allocation2 + $0xa8] sm:$0xff] }
  0x36   :  { %v49_v61 = vld [vmem:[#allocation2 + $0x30] sm:$0xff]  ;;  %v50_v63 = vld [vmem:[#allocation2 + $0x38] sm:$0xff]  ;;  %v51_v2 = vld [vmem:[#allocation2 + $0x40] sm:$0xff] }
  0x37   :  { %473 = vmatpush1.bf16.msra.mxu0 %v472_v26  ;;  %501 = vmatpush1.bf16.msra.mxu1 %v472_v26  ;;  %v65_v62 = vld [vmem:[#allocation2 + $0xb0] sm:$0xff]  ;;  %v66_v1 = vld [vmem:[#allocation2 + $0xb8] sm:$0xff]  ;;  %v67_v3 = vld [vmem:[#allocation2 + $0xc0] sm:$0xff] }
  0x38   :  { %475 = vmatprep.subr.bf16.mxu0 %v474_v27  ;;  %494 = vmatprep.subr.bf16.mxu1 %v474_v27  ;;  %v52_v4 = vld [vmem:[#allocation2 + $0x48] sm:$0xff]  ;;  %v53_v6 = vld [vmem:[#allocation2 + $0x50] sm:$0xff]  ;;  %v54_v8 = vld [vmem:[#allocation2 + $0x58] sm:$0xff] }
  0x39   :  { %v68_v5 = vld [vmem:[#allocation2 + $0xc8] sm:$0xff]  ;;  %v69_v7 = vld [vmem:[#allocation2 + $0xd0] sm:$0xff]  ;;  %v70_v9 = vld [vmem:[#allocation2 + $0xd8] sm:$0xff] }
  0x3a   :  { %v55_v10 = vld [vmem:[#allocation2 + $0x60] sm:$0xff]  ;;  %v56_v12 = vld [vmem:[#allocation2 + $0x68] sm:$0xff]  ;;  %v57_v14 = vld [vmem:[#allocation2 + $0x70] sm:$0xff] }
  0x3b   :  { %477 = vmatpush1.bf16.msra.mxu0 %v476_v32  ;;  %502 = vmatpush1.bf16.msra.mxu1 %v476_v32  ;;  %v71_v11 = vld [vmem:[#allocation2 + $0xe0] sm:$0xff]  ;;  %v72_v13 = vld [vmem:[#allocation2 + $0xe8] sm:$0xff]  ;;  %v73_v15 = vld [vmem:[#allocation2 + $0xf0] sm:$0xff] }
  0x3c   :  { %479 = vmatprep.subr.bf16.mxu0 %v478_v33  ;;  %495 = vmatprep.subr.bf16.mxu1 %v478_v33  ;;  %v58_v16 = vld [vmem:[#allocation2 + $0x78] sm:$0xff]  ;;  %v107_v21 = vld [vmem:[%s761_s2] sm:$0x3]  ;;  %s593_s2 = smov [#allocation7]  }
  0x3d   :  { %v74_v17 = vld [vmem:[#allocation2 + $0xf8] sm:$0xff]  ;;  %v676_v23 = vrot.slane %v107_v21, %v111_v20  ;;  %v678_v24 = vrot.slane %v107_v21, %v115_v22  ;;  %s445_s13 = sshll.u32 %s593_s2, 4  ;;  %s446_s13 = int_to_ptr.vmem [resolvable:$true] %s445_s13 }
  0x3e   :  { %s558_s14 = scalar_lea.vmem %s446_s13, 8192  ;;  %p563_p3 = scmp.lt.s32.totalorder %s446_s13, %s446_s13 }
  0x3f   :  { %481 = vmatpush1.bf16.msra.mxu0 %v480_v38  ;;  %503 = vmatpush1.bf16.msra.mxu1 %v480_v38  ;;  %p559_p2 = scmp.ne.s32.totalorder %s446_s13, %s558_s14  ;;  %p564_p4 = scmp.lt.s32.totalorder %s558_s14, %s558_s14 }
  0x40   :  { %483 = vmatprep.subr.bf16.mxu0 %v482_v39  ;;  %496 = vmatprep.subr.bf16.mxu1 %v482_v39 }
  0x41   :  { %p565_p5 = por %p564_p4, %p563_p3 }
  0x43   :  { %485 = vmatpush1.bf16.msra.mxu0 %v484_v44  ;;  %504 = vmatpush1.bf16.msra.mxu1 %v484_v44  ;;  %p566_p6 = pnand %p565_p5, %p559_p2 }
  0x44   :  { %487 = vmatprep.subr.bf16.mxu0 %v486_v45  ;;  %497 = vmatprep.subr.bf16.mxu1 %v486_v45 }
  0x47   :  { %489 = vmatpush1.bf16.msra.mxu0 %v488_v48  ;;  %505 = vmatpush1.bf16.msra.mxu1 %v488_v48 }
  0x4a   :  { %184 = vmatmul.mubr.f32.vlgmr.msra.gmra.mrb[0].mxu0 %v43_v49  ;;  %280 = vmatmul.mubr.f32.vlgmr.msra.gmra.mrb[0].mxu1 %v59_v50 }
  0x4b   :  { %189 = vmatprep.mubr.f32.mxu0 %v592_v0  ;;  %285 = vmatprep.mubr.f32.mxu1 %v592_v0 }
  0x4e   :  { %190 = vmatmul.mubr.f32.gmra.mrb[2].mxu0 %v44_v51  ;;  %286 = vmatmul.mubr.f32.gmra.mrb[2].mxu1 %v60_v52 }
  0x4f   :  { %195 = vmatprep.mubr.f32.mxu0 %v592_v0  ;;  %291 = vmatprep.mubr.f32.mxu1 %v592_v0 }
  0x52   :  { %196 = vmatmul.mubr.f32.gmra.mrb[4].mxu0 %v45_v53  ;;  %292 = vmatmul.mubr.f32.gmra.mrb[4].mxu1 %v61_v54 }
  0x53   :  { %201 = vmatprep.mubr.f32.mxu0 %v592_v0  ;;  %297 = vmatprep.mubr.f32.mxu1 %v592_v0 }
  0x56   :  { %202 = vmatmul.mubr.f32.gmra.mrb[6].mxu0 %v46_v55  ;;  %298 = vmatmul.mubr.f32.gmra.mrb[6].mxu1 %v62_v56 }
  0x57   :  { %207 = vmatprep.mubr.f32.mxu0 %v592_v0  ;;  %303 = vmatprep.mubr.f32.mxu1 %v592_v0 }
  0x5a   :  { %208 = vmatmul.mubr.f32.gmra.mrb[8].mxu0 %v47_v57  ;;  %304 = vmatmul.mubr.f32.gmra.mrb[8].mxu1 %v63_v58 }
  0x5b   :  { %213 = vmatprep.mubr.f32.mxu0 %v592_v0  ;;  %309 = vmatprep.mubr.f32.mxu1 %v592_v0 }
  0x5e   :  { %214 = vmatmul.mubr.f32.gmra.mrb[10].mxu0 %v48_v59  ;;  %310 = vmatmul.mubr.f32.gmra.mrb[10].mxu1 %v64_v60 }
  0x5f   :  { %219 = vmatprep.mubr.f32.mxu0 %v592_v0  ;;  %315 = vmatprep.mubr.f32.mxu1 %v592_v0 }
  0x62   :  { %220 = vmatmul.mubr.f32.gmra.mrb[12].mxu0 %v49_v61  ;;  %316 = vmatmul.mubr.f32.gmra.mrb[12].mxu1 %v65_v62 }
  0x63   :  { %225 = vmatprep.mubr.f32.mxu0 %v592_v0  ;;  %321 = vmatprep.mubr.f32.mxu1 %v592_v0 }
  0x66   :  { %226 = vmatmul.mubr.f32.gmra.mrb[14].mxu0 %v50_v63  ;;  %322 = vmatmul.mubr.f32.gmra.mrb[14].mxu1 %v66_v1 }
  0x67   :  { %231 = vmatprep.mubr.f32.mxu0 %v592_v0  ;;  %327 = vmatprep.mubr.f32.mxu1 %v592_v0 }
  0x6a   :  { %232 = vmatmul.mubr.f32.gmra.mrb[16].mxu0 %v51_v2  ;;  %328 = vmatmul.mubr.f32.gmra.mrb[16].mxu1 %v67_v3 }
  0x6b   :  { %237 = vmatprep.mubr.f32.mxu0 %v592_v0  ;;  %333 = vmatprep.mubr.f32.mxu1 %v592_v0 }
  0x6e   :  { %238 = vmatmul.mubr.f32.gmra.mrb[18].mxu0 %v52_v4  ;;  %334 = vmatmul.mubr.f32.gmra.mrb[18].mxu1 %v68_v5 }
  0x6f   :  { %243 = vmatprep.mubr.f32.mxu0 %v592_v0  ;;  %339 = vmatprep.mubr.f32.mxu1 %v592_v0 }
  0x72   :  { %244 = vmatmul.mubr.f32.gmra.mrb[20].mxu0 %v53_v6  ;;  %340 = vmatmul.mubr.f32.gmra.mrb[20].mxu1 %v69_v7 }
  0x73   :  { %249 = vmatprep.mubr.f32.mxu0 %v592_v0  ;;  %345 = vmatprep.mubr.f32.mxu1 %v592_v0 }
  0x76   :  { %250 = vmatmul.mubr.f32.gmra.mrb[22].mxu0 %v54_v8  ;;  %346 = vmatmul.mubr.f32.gmra.mrb[22].mxu1 %v70_v9 }
  0x77   :  { %255 = vmatprep.mubr.f32.mxu0 %v592_v0  ;;  %351 = vmatprep.mubr.f32.mxu1 %v592_v0 }
  0x7a   :  { %256 = vmatmul.mubr.f32.gmra.mrb[24].mxu0 %v55_v10  ;;  %352 = vmatmul.mubr.f32.gmra.mrb[24].mxu1 %v71_v11 }
  0x7b   :  { %261 = vmatprep.mubr.f32.mxu0 %v592_v0  ;;  %357 = vmatprep.mubr.f32.mxu1 %v592_v0 }
  0x7e   :  { %262 = vmatmul.mubr.f32.gmra.mrb[26].mxu0 %v56_v12  ;;  %358 = vmatmul.mubr.f32.gmra.mrb[26].mxu1 %v72_v13 }
  0x7f   :  { %267 = vmatprep.mubr.f32.mxu0 %v592_v0  ;;  %363 = vmatprep.mubr.f32.mxu1 %v592_v0 }
  0x82   :  { %268 = vmatmul.mubr.f32.gmra.mrb[28].mxu0 %v57_v14  ;;  %364 = vmatmul.mubr.f32.gmra.mrb[28].mxu1 %v73_v15 }
  0x83   :  { %273 = vmatprep.mubr.f32.mxu0 %v592_v0  ;;  %369 = vmatprep.mubr.f32.mxu1 %v592_v0 }
  0x86   :  { %274 = vmatmul.mubr.f32.gmra.mrb[30].mxu0 %v58_v16  ;;  %370 = vmatmul.mubr.f32.gmra.mrb[30].mxu1 %v74_v17 }
 0x11d   :  { %v185_v25 = vpop.f32.mrb[0].mxu0  ;;  %v281_v26 = vpop.f32.mrb[0].mxu1 }
 0x11e   :  { %v186_v0 = vadd.f32 %v185_v25, %v676_v23  ;;  %v282_v27 = vadd.f32 %v281_v26, %v676_v23  ;;  %v187_v28 = vpop.f32.mrb[1].mxu0  ;;  %v283_v29 = vpop.f32.mrb[1].mxu1 }
 0x11f   :  { %v188_v30 = vadd.f32 %v187_v28, %v678_v24  ;;  %v284_v31 = vadd.f32 %v283_v29, %v678_v24 }
 0x120   :  { %376 = vst [vmem:[#allocation7] sm:$0xff] %v186_v0  ;;  %408 = vst [vmem:[#allocation7 + $0x100] sm:$0xff] %v282_v27 }
 0x121   :  { %377 = vst [vmem:[#allocation7 + $0x8] sm:$0xff] %v188_v30  ;;  %409 = vst [vmem:[#allocation7 + $0x108] sm:$0xff] %v284_v31  ;;  %v191_v32 = vpop.f32.mrb[2].mxu0  ;;  %v287_v33 = vpop.f32.mrb[2].mxu1 }
 0x122   :  { %v192_v34 = vadd.f32 %v191_v32, %v676_v23  ;;  %v288_v35 = vadd.f32 %v287_v33, %v676_v23  ;;  %v193_v36 = vpop.f32.mrb[3].mxu0  ;;  %v289_v37 = vpop.f32.mrb[3].mxu1 }
 0x123   :  { %v194_v38 = vadd.f32 %v193_v36, %v678_v24  ;;  %v290_v39 = vadd.f32 %v289_v37, %v678_v24 }
 0x124   :  { %378 = vst [vmem:[#allocation7 + $0x10] sm:$0xff] %v192_v34  ;;  %410 = vst [vmem:[#allocation7 + $0x110] sm:$0xff] %v288_v35 }
 0x125   :  { %379 = vst [vmem:[#allocation7 + $0x18] sm:$0xff] %v194_v38  ;;  %411 = vst [vmem:[#allocation7 + $0x118] sm:$0xff] %v290_v39  ;;  %v197_v40 = vpop.f32.mrb[4].mxu0  ;;  %v293_v41 = vpop.f32.mrb[4].mxu1 }
 0x126   :  { %v198_v42 = vadd.f32 %v197_v40, %v676_v23  ;;  %v294_v43 = vadd.f32 %v293_v41, %v676_v23  ;;  %v199_v44 = vpop.f32.mrb[5].mxu0  ;;  %v295_v45 = vpop.f32.mrb[5].mxu1 }
 0x127   :  { %v200_v46 = vadd.f32 %v199_v44, %v678_v24  ;;  %v296_v47 = vadd.f32 %v295_v45, %v678_v24 }
 0x128   :  { %380 = vst [vmem:[#allocation7 + $0x20] sm:$0xff] %v198_v42  ;;  %412 = vst [vmem:[#allocation7 + $0x120] sm:$0xff] %v294_v43 }
 0x129   :  { %381 = vst [vmem:[#allocation7 + $0x28] sm:$0xff] %v200_v46  ;;  %413 = vst [vmem:[#allocation7 + $0x128] sm:$0xff] %v296_v47  ;;  %v203_v48 = vpop.f32.mrb[6].mxu0  ;;  %v299_v49 = vpop.f32.mrb[6].mxu1 }
 0x12a   :  { %v204_v50 = vadd.f32 %v203_v48, %v676_v23  ;;  %v300_v51 = vadd.f32 %v299_v49, %v676_v23  ;;  %v205_v52 = vpop.f32.mrb[7].mxu0  ;;  %v301_v53 = vpop.f32.mrb[7].mxu1 }
 0x12b   :  { %v206_v54 = vadd.f32 %v205_v52, %v678_v24  ;;  %v302_v55 = vadd.f32 %v301_v53, %v678_v24 }
 0x12c   :  { %382 = vst [vmem:[#allocation7 + $0x30] sm:$0xff] %v204_v50  ;;  %414 = vst [vmem:[#allocation7 + $0x130] sm:$0xff] %v300_v51 }
 0x12d   :  { %383 = vst [vmem:[#allocation7 + $0x38] sm:$0xff] %v206_v54  ;;  %415 = vst [vmem:[#allocation7 + $0x138] sm:$0xff] %v302_v55  ;;  %v209_v56 = vpop.f32.mrb[8].mxu0  ;;  %v305_v57 = vpop.f32.mrb[8].mxu1 }
 0x12e   :  { %v210_v58 = vadd.f32 %v209_v56, %v676_v23  ;;  %v306_v59 = vadd.f32 %v305_v57, %v676_v23  ;;  %v211_v60 = vpop.f32.mrb[9].mxu0  ;;  %v307_v61 = vpop.f32.mrb[9].mxu1 }
 0x12f   :  { %v212_v62 = vadd.f32 %v211_v60, %v678_v24  ;;  %v308_v63 = vadd.f32 %v307_v61, %v678_v24 }
 0x130   :  { %384 = vst [vmem:[#allocation7 + $0x40] sm:$0xff] %v210_v58  ;;  %416 = vst [vmem:[#allocation7 + $0x140] sm:$0xff] %v306_v59 }
 0x131   :  { %385 = vst [vmem:[#allocation7 + $0x48] sm:$0xff] %v212_v62  ;;  %417 = vst [vmem:[#allocation7 + $0x148] sm:$0xff] %v308_v63  ;;  %v215_v1 = vpop.f32.mrb[10].mxu0  ;;  %v311_v2 = vpop.f32.mrb[10].mxu1 }
 0x132   :  { %v216_v3 = vadd.f32 %v215_v1, %v676_v23  ;;  %v312_v4 = vadd.f32 %v311_v2, %v676_v23  ;;  %v217_v5 = vpop.f32.mrb[11].mxu0  ;;  %v313_v6 = vpop.f32.mrb[11].mxu1 }
 0x133   :  { %v218_v7 = vadd.f32 %v217_v5, %v678_v24  ;;  %v314_v8 = vadd.f32 %v313_v6, %v678_v24 }
 0x134   :  { %386 = vst [vmem:[#allocation7 + $0x50] sm:$0xff] %v216_v3  ;;  %418 = vst [vmem:[#allocation7 + $0x150] sm:$0xff] %v312_v4 }
 0x135   :  { %387 = vst [vmem:[#allocation7 + $0x58] sm:$0xff] %v218_v7  ;;  %419 = vst [vmem:[#allocation7 + $0x158] sm:$0xff] %v314_v8  ;;  %v221_v9 = vpop.f32.mrb[12].mxu0  ;;  %v317_v10 = vpop.f32.mrb[12].mxu1 }
 0x136   :  { %v222_v11 = vadd.f32 %v221_v9, %v676_v23  ;;  %v318_v12 = vadd.f32 %v317_v10, %v676_v23  ;;  %v223_v13 = vpop.f32.mrb[13].mxu0  ;;  %v319_v14 = vpop.f32.mrb[13].mxu1 }
 0x137   :  { %v224_v15 = vadd.f32 %v223_v13, %v678_v24  ;;  %v320_v16 = vadd.f32 %v319_v14, %v678_v24 }
 0x138   :  { %388 = vst [vmem:[#allocation7 + $0x60] sm:$0xff] %v222_v11  ;;  %420 = vst [vmem:[#allocation7 + $0x160] sm:$0xff] %v318_v12 }
 0x139   :  { %389 = vst [vmem:[#allocation7 + $0x68] sm:$0xff] %v224_v15  ;;  %421 = vst [vmem:[#allocation7 + $0x168] sm:$0xff] %v320_v16  ;;  %v227_v17 = vpop.f32.mrb[14].mxu0  ;;  %v323_v18 = vpop.f32.mrb[14].mxu1 }
 0x13a   :  { %v228_v19 = vadd.f32 %v227_v17, %v676_v23  ;;  %v324_v20 = vadd.f32 %v323_v18, %v676_v23  ;;  %v229_v21 = vpop.f32.mrb[15].mxu0  ;;  %v325_v22 = vpop.f32.mrb[15].mxu1 }
 0x13b   :  { %v230_v25 = vadd.f32 %v229_v21, %v678_v24  ;;  %v326_v26 = vadd.f32 %v325_v22, %v678_v24 }
 0x13c   :  { %390 = vst [vmem:[#allocation7 + $0x70] sm:$0xff] %v228_v19  ;;  %422 = vst [vmem:[#allocation7 + $0x170] sm:$0xff] %v324_v20 }
 0x13d   :  { %391 = vst [vmem:[#allocation7 + $0x78] sm:$0xff] %v230_v25  ;;  %423 = vst [vmem:[#allocation7 + $0x178] sm:$0xff] %v326_v26  ;;  %v233_v0 = vpop.f32.mrb[16].mxu0  ;;  %v329_v27 = vpop.f32.mrb[16].mxu1 }
 0x13e   :  { %v234_v28 = vadd.f32 %v233_v0, %v676_v23  ;;  %v330_v29 = vadd.f32 %v329_v27, %v676_v23  ;;  %v235_v30 = vpop.f32.mrb[17].mxu0  ;;  %v331_v31 = vpop.f32.mrb[17].mxu1 }
 0x13f   :  { %v236_v32 = vadd.f32 %v235_v30, %v678_v24  ;;  %v332_v33 = vadd.f32 %v331_v31, %v678_v24 }
 0x140   :  { %392 = vst [vmem:[#allocation7 + $0x80] sm:$0xff] %v234_v28  ;;  %424 = vst [vmem:[#allocation7 + $0x180] sm:$0xff] %v330_v29 }
 0x141   :  { %393 = vst [vmem:[#allocation7 + $0x88] sm:$0xff] %v236_v32  ;;  %425 = vst [vmem:[#allocation7 + $0x188] sm:$0xff] %v332_v33  ;;  %v239_v34 = vpop.f32.mrb[18].mxu0  ;;  %v335_v35 = vpop.f32.mrb[18].mxu1 }
 0x142   :  { %v240_v36 = vadd.f32 %v239_v34, %v676_v23  ;;  %v336_v37 = vadd.f32 %v335_v35, %v676_v23  ;;  %v241_v38 = vpop.f32.mrb[19].mxu0  ;;  %v337_v39 = vpop.f32.mrb[19].mxu1 }
 0x143   :  { %v242_v40 = vadd.f32 %v241_v38, %v678_v24  ;;  %v338_v41 = vadd.f32 %v337_v39, %v678_v24 }
 0x144   :  { %394 = vst [vmem:[#allocation7 + $0x90] sm:$0xff] %v240_v36  ;;  %426 = vst [vmem:[#allocation7 + $0x190] sm:$0xff] %v336_v37 }
 0x145   :  { %395 = vst [vmem:[#allocation7 + $0x98] sm:$0xff] %v242_v40  ;;  %427 = vst [vmem:[#allocation7 + $0x198] sm:$0xff] %v338_v41  ;;  %v245_v42 = vpop.f32.mrb[20].mxu0  ;;  %v341_v43 = vpop.f32.mrb[20].mxu1 }
 0x146   :  { %v246_v44 = vadd.f32 %v245_v42, %v676_v23  ;;  %v342_v45 = vadd.f32 %v341_v43, %v676_v23  ;;  %v247_v46 = vpop.f32.mrb[21].mxu0  ;;  %v343_v47 = vpop.f32.mrb[21].mxu1 }
 0x147   :  { %v248_v48 = vadd.f32 %v247_v46, %v678_v24  ;;  %v344_v49 = vadd.f32 %v343_v47, %v678_v24 }
 0x148   :  { %396 = vst [vmem:[#allocation7 + $0xa0] sm:$0xff] %v246_v44  ;;  %428 = vst [vmem:[#allocation7 + $0x1a0] sm:$0xff] %v342_v45 }
 0x149   :  { %397 = vst [vmem:[#allocation7 + $0xa8] sm:$0xff] %v248_v48  ;;  %429 = vst [vmem:[#allocation7 + $0x1a8] sm:$0xff] %v344_v49  ;;  %v251_v50 = vpop.f32.mrb[22].mxu0  ;;  %v347_v51 = vpop.f32.mrb[22].mxu1 }
 0x14a   :  { %v252_v52 = vadd.f32 %v251_v50, %v676_v23  ;;  %v348_v53 = vadd.f32 %v347_v51, %v676_v23  ;;  %v253_v54 = vpop.f32.mrb[23].mxu0  ;;  %v349_v55 = vpop.f32.mrb[23].mxu1 }
 0x14b   :  { %v254_v56 = vadd.f32 %v253_v54, %v678_v24  ;;  %v350_v57 = vadd.f32 %v349_v55, %v678_v24 }
 0x14c   :  { %398 = vst [vmem:[#allocation7 + $0xb0] sm:$0xff] %v252_v52  ;;  %430 = vst [vmem:[#allocation7 + $0x1b0] sm:$0xff] %v348_v53 }
 0x14d   :  { %399 = vst [vmem:[#allocation7 + $0xb8] sm:$0xff] %v254_v56  ;;  %431 = vst [vmem:[#allocation7 + $0x1b8] sm:$0xff] %v350_v57  ;;  %v257_v58 = vpop.f32.mrb[24].mxu0  ;;  %v353_v59 = vpop.f32.mrb[24].mxu1 }
 0x14e   :  { %v258_v60 = vadd.f32 %v257_v58, %v676_v23  ;;  %v354_v61 = vadd.f32 %v353_v59, %v676_v23  ;;  %v259_v62 = vpop.f32.mrb[25].mxu0  ;;  %v355_v63 = vpop.f32.mrb[25].mxu1 }
 0x14f   :  { %v260_v1 = vadd.f32 %v259_v62, %v678_v24  ;;  %v356_v2 = vadd.f32 %v355_v63, %v678_v24 }
 0x150   :  { %400 = vst [vmem:[#allocation7 + $0xc0] sm:$0xff] %v258_v60  ;;  %432 = vst [vmem:[#allocation7 + $0x1c0] sm:$0xff] %v354_v61 }
 0x151   :  { %401 = vst [vmem:[#allocation7 + $0xc8] sm:$0xff] %v260_v1  ;;  %433 = vst [vmem:[#allocation7 + $0x1c8] sm:$0xff] %v356_v2  ;;  %v263_v3 = vpop.f32.mrb[26].mxu0  ;;  %v359_v4 = vpop.f32.mrb[26].mxu1 }
 0x152   :  { %v264_v5 = vadd.f32 %v263_v3, %v676_v23  ;;  %v360_v6 = vadd.f32 %v359_v4, %v676_v23  ;;  %v265_v7 = vpop.f32.mrb[27].mxu0  ;;  %v361_v8 = vpop.f32.mrb[27].mxu1 }
 0x153   :  { %v266_v9 = vadd.f32 %v265_v7, %v678_v24  ;;  %v362_v10 = vadd.f32 %v361_v8, %v678_v24 }
 0x154   :  { %402 = vst [vmem:[#allocation7 + $0xd0] sm:$0xff] %v264_v5  ;;  %434 = vst [vmem:[#allocation7 + $0x1d0] sm:$0xff] %v360_v6 }
 0x155   :  { %403 = vst [vmem:[#allocation7 + $0xd8] sm:$0xff] %v266_v9  ;;  %435 = vst [vmem:[#allocation7 + $0x1d8] sm:$0xff] %v362_v10  ;;  %v269_v11 = vpop.f32.mrb[28].mxu0  ;;  %v365_v12 = vpop.f32.mrb[28].mxu1 }
 0x156   :  { %v270_v13 = vadd.f32 %v269_v11, %v676_v23  ;;  %v366_v14 = vadd.f32 %v365_v12, %v676_v23  ;;  %v271_v15 = vpop.f32.mrb[29].mxu0  ;;  %v367_v16 = vpop.f32.mrb[29].mxu1 }
 0x157   :  { %v272_v17 = vadd.f32 %v271_v15, %v678_v24  ;;  %v368_v18 = vadd.f32 %v367_v16, %v678_v24 }
 0x158   :  { %404 = vst [vmem:[#allocation7 + $0xe0] sm:$0xff] %v270_v13  ;;  %436 = vst [vmem:[#allocation7 + $0x1e0] sm:$0xff] %v366_v14 }
 0x159   :  { %405 = vst [vmem:[#allocation7 + $0xe8] sm:$0xff] %v272_v17  ;;  %437 = vst [vmem:[#allocation7 + $0x1e8] sm:$0xff] %v368_v18  ;;  %v275_v19 = vpop.f32.mrb[30].mxu0  ;;  %v371_v20 = vpop.f32.mrb[30].mxu1 }
 0x15a   :  { %v276_v21 = vadd.f32 %v275_v19, %v676_v23  ;;  %v372_v22 = vadd.f32 %v371_v20, %v676_v23  ;;  %v277_v25 = vpop.f32.mrb[31].mxu0  ;;  %v373_v26 = vpop.f32.mrb[31].mxu1 }
 0x15b   :  { %v278_v0 = vadd.f32 %v277_v25, %v678_v24  ;;  %v374_v27 = vadd.f32 %v373_v26, %v678_v24 }
 0x15c   :  { %406 = vst [vmem:[#allocation7 + $0xf0] sm:$0xff] %v276_v21  ;;  %438 = vst [vmem:[#allocation7 + $0x1f0] sm:$0xff] %v372_v22 }
 0x15d   :  { %407 = vst [vmem:[#allocation7 + $0xf8] sm:$0xff] %v278_v0  ;;  %439 = vst [vmem:[#allocation7 + $0x1f8] sm:$0xff] %v374_v27 }
 0x15e   :  { %569 = shalt.err (!%p566_p6)
}
 0x15f   :  { %s570_s17 = scalar_lea.hbm %s762_s3, 8192 }
 0x160   :  { %p571_p7 = scmp.ne.s32.totalorder %s762_s3, %s570_s17  ;;  %p574_p8 = scmp.lt.u32.totalorder %s570_s17, %s762_s3 }
 0x162   :  { %p576_p9 = pnand %p574_p8, %p571_p7 }
 0x164   :  { %579 = shalt.err (!%p576_p9)
}
 0x165   :  { %451 = dma.vmem_to_hbm [thread:$0]  %s446_s13, 8192, %s762_s3, [#allocation4], %s590_s0, %s590_s0, %s591_s9  }
 0x166   :  { %584 = dma.done.wait [#allocation4], 8192  }
 0x167   :  { %585 = vsyncadd [#allocation4], 4294959104 }
 0x168   :  { %455 = vsyncpa [#allocation3], 1 }
 0x169   :  { %456 = vsyncpa [#allocation6], 1 }
 0x16a   :  { %457 = vsyncpa [#allocation4], 1 }

</bundles_post_ra>
